<compile_context>
chip_gen: v7x
topology: tpu7x:2x2x1
jax: 0.10.0
libtpu: 0.0.40
codegen_flags: <defaults>
</compile_context>

<pallas_src>
import functools

import jax
import jax.numpy as jnp
from jax.experimental import pallas as pl
from jax.experimental.pallas import tpu as pltpu


LANE = 128
SUBLANE_BF16 = 16          # bf16 vregs pack (16, 128) -> 16-row alignment


def _round_up(a, m):
    return ((a + m - 1) // m) * m


# --------------------------------------------------------------------------
# Kernel: one batch tile per grid step, weights resident across the grid.
# --------------------------------------------------------------------------
def encoder_kernel(x_ref, w1_ref, b1_ref, w2_ref, b2_ref, wh_ref, bh_ref,
                   eps_ref, out_ref, *, l_pad):
    # h1 = relu(x @ W1 + b1)        (bf16 x bf16 -> f32 accumulate on MXU)
    h1 = jnp.dot(x_ref[...], w1_ref[...], preferred_element_type=jnp.float32)
    h1 = jnp.maximum(h1 + b1_ref[...], 0.0)

    # h2 = relu(h1 @ W2 + b2)
    h2 = jnp.dot(h1.astype(jnp.bfloat16), w2_ref[...],
                 preferred_element_type=jnp.float32)
    h2 = jnp.maximum(h2 + b2_ref[...], 0.0)

    # Fused heads: cols [0:l_pad) -> z_mean, [l_pad:2*l_pad) -> log_var.
    heads = jnp.dot(h2.astype(jnp.bfloat16), wh_ref[...],
                    preferred_element_type=jnp.float32) + bh_ref[...]

    z_mean = heads[:, :l_pad]          # 128-aligned slices (no lane shuffle)
    log_var = heads[:, l_pad:]

    # Reparameterization kept in f32 (exp + fma), downcast only at the store.
    z = z_mean + jnp.exp(0.5 * log_var) * eps_ref[...]

    # Single packed, lane-dense output tile: [z_mean | log_var | z] (bf16).
    out_ref[:, : 2 * l_pad] = heads.astype(out_ref.dtype)
    out_ref[:, 2 * l_pad:] = z.astype(out_ref.dtype)


# --------------------------------------------------------------------------
# Parameter init (matches nn.Linear default init; weights stored [in, out])
# and packing (lane padding, head fusion, bf16 cast).
# --------------------------------------------------------------------------
def init_params(key, input_dim, hidden_dims, latent_dim):
    ks = jax.random.split(key, 8)

    def linear(kw, kb, fan_in, fan_out):
        bound = 1.0 / jnp.sqrt(fan_in)
        w = jax.random.uniform(kw, (fan_in, fan_out), jnp.float32, -bound, bound)
        b = jax.random.uniform(kb, (1, fan_out), jnp.float32, -bound, bound)
        return w, b

    w1, b1 = linear(ks[0], ks[1], input_dim, hidden_dims[0])
    w2, b2 = linear(ks[2], ks[3], hidden_dims[0], hidden_dims[1])
    wm, bm = linear(ks[4], ks[5], hidden_dims[1], latent_dim)
    wv, bv = linear(ks[6], ks[7], hidden_dims[1], latent_dim)
    return dict(w1=w1, b1=b1, w2=w2, b2=b2, wm=wm, bm=bm, wv=wv, bv=bv)


def pack_params(params):
    """Zero-pad all feature dims to 128, fuse z_mean/log_var heads, cast
    matmul weights to bf16 (biases stay f32).  Called once, outside jit."""
    d, h1 = params["w1"].shape
    h2 = params["w2"].shape[1]
    latent = params["wm"].shape[1]
    d_p, h1_p, h2_p, l_p = (_round_up(v, LANE) for v in (d, h1, h2, latent))

    def pad2(a, rows, cols):
        return jnp.pad(a, ((0, rows - a.shape[0]), (0, cols - a.shape[1])))

    w1 = pad2(params["w1"], d_p, h1_p).astype(jnp.bfloat16)
    b1 = pad2(params["b1"], 1, h1_p)                      # f32
    w2 = pad2(params["w2"], h1_p, h2_p).astype(jnp.bfloat16)
    b2 = pad2(params["b2"], 1, h2_p)                      # f32
    wh = jnp.concatenate([pad2(params["wm"], h2_p, l_p),
                          pad2(params["wv"], h2_p, l_p)], axis=1
                         ).astype(jnp.bfloat16)           # [h2_p, 2*l_p]
    bh = jnp.concatenate([pad2(params["bm"], 1, l_p),
                          pad2(params["bv"], 1, l_p)], axis=1)  # f32
    return dict(w1=w1, b1=b1, w2=w2, b2=b2, wh=wh, bh=bh)


# --------------------------------------------------------------------------
# Tiling / VMEM budgeting helpers (all static Python-int math, trace-time).
# --------------------------------------------------------------------------
def _choose_batch_tiling(b):
    """Return (tile_rows, padded_batch); both multiples of 16 (bf16 packing)."""
    b16 = _round_up(max(b, 1), SUBLANE_BF16)
    if b16 <= 128:
        return b16, b16                      # single full-extent tile
    # Prefer 256-row tiles (fills the 256-wide MXU M edge on v6e/v7x), but
    # (a) require >= 2 grid steps so both v7x TensorCores get work, and
    # (b) keep batch-padding waste <= ~25 %.
    for tb in (256, 128, 64, 32, 16):
        b_pad = _round_up(b16, tb)
        if b_pad // tb < 2:
            continue
        if (b_pad - b) / b_pad <= 0.25:
            return tb, b_pad
    return SUBLANE_BF16, b16


@functools.lru_cache(maxsize=1)
def _physical_vmem_bytes():
    try:
        info = pltpu.get_tpu_info()
        return int(getattr(info, "vmem_capacity_bytes", 64 << 20))
    except Exception:
        return 64 << 20                      # conservative: v7x per-TC VMEM


def _vmem_limit_bytes(tb, d_pad, h1_pad, h2_pad, l_pad):
    bf16, f32 = 2, 4
    weights = (d_pad * h1_pad + h1_pad * h2_pad + h2_pad * 2 * l_pad) * bf16  # Buffered(1)
    biases = (h1_pad + h2_pad + 2 * l_pad) * f32
    streams = 2 * tb * (d_pad * bf16 + l_pad * f32 + 3 * l_pad * bf16)        # double-buffered tiles
    interm = tb * (h1_pad + h2_pad + 3 * l_pad) * f32                         # h1/h2/heads/z temporaries
    need = weights + biases + streams + interm + (4 << 20)                    # headroom
    ceiling = max((_physical_vmem_bytes() * 3) // 4, 32 << 20)                # ~48 MiB v7x, ~96 MiB v5e/v6e
    return int(min(max(need, 16 << 20), ceiling))


def padded_latent_shape(packed, batch):
    """Shape at which to sample epsilon so the kernel needs no eps padding."""
    _, b_pad = _choose_batch_tiling(batch)
    return b_pad, packed["wh"].shape[1] // 2


# --------------------------------------------------------------------------
# Forward wrapper.
# --------------------------------------------------------------------------
@functools.partial(jax.jit, static_argnames=("latent_dim",))
def encoder_forward(x, packed, epsilon, *, latent_dim):
    """x: [B, ...] (flattened internally).
    epsilon: [B, latent_dim] or already-padded [b_pad, l_pad] (preferred).
    Returns (z_mean, log_var, z), each [B, latent_dim] float32."""
    b = x.shape[0]
    d_pad, h1_pad = packed["w1"].shape
    h2_pad = packed["w2"].shape[1]
    l_pad = packed["wh"].shape[1] // 2

    tb, b_pad = _choose_batch_tiling(b)

    # Input prep: cast to bf16 BEFORE padding (halves pad bytes); skip the pad
    # entirely when the shape is already aligned.
    x_flat = x.reshape(b, -1).astype(jnp.bfloat16)
    d = x_flat.shape[1]
    if (b, d) != (b_pad, d_pad):
        x_flat = jnp.pad(x_flat, ((0, b_pad - b), (0, d_pad - d)))

    # Epsilon: accept an already-padded sample (no wrapper inflation pass).
    if epsilon.shape == (b_pad, l_pad):
        eps_p = epsilon.astype(jnp.float32)
    else:
        eps_p = jnp.pad(epsilon.astype(jnp.float32),
                        ((0, b_pad - epsilon.shape[0]),
                         (0, l_pad - epsilon.shape[1])))

    kernel = functools.partial(encoder_kernel, l_pad=l_pad)
    resident = pl.Buffered(1)   # constant-index blocks: single VMEM buffer

    w_elems = d_pad * h1_pad + h1_pad * h2_pad + h2_pad * 2 * l_pad
    flops = 2 * b_pad * w_elems
    bytes_accessed = (b_pad * d_pad * 2 + b_pad * l_pad * 4
                      + b_pad * 3 * l_pad * 2
                      + w_elems * 2
                      + (h1_pad + h2_pad + 2 * l_pad) * 4)

    out = pl.pallas_call(
        kernel,
        out_shape=jax.ShapeDtypeStruct((b_pad, 3 * l_pad), jnp.bfloat16),
        grid=(b_pad // tb,),
        in_specs=[
            pl.BlockSpec((tb, d_pad), lambda i: (i, 0)),                  # x tile
            pl.BlockSpec((d_pad, h1_pad), lambda i: (0, 0),
                         pipeline_mode=resident),                         # W1
            pl.BlockSpec((1, h1_pad), lambda i: (0, 0),
                         pipeline_mode=resident),                         # b1
            pl.BlockSpec((h1_pad, h2_pad), lambda i: (0, 0),
                         pipeline_mode=resident),                         # W2
            pl.BlockSpec((1, h2_pad), lambda i: (0, 0),
                         pipeline_mode=resident),                         # b2
            pl.BlockSpec((h2_pad, 2 * l_pad), lambda i: (0, 0),
                         pipeline_mode=resident),                         # fused heads W
            pl.BlockSpec((1, 2 * l_pad), lambda i: (0, 0),
                         pipeline_mode=resident),                         # fused heads b
            pl.BlockSpec((tb, l_pad), lambda i: (i, 0)),                  # eps tile
        ],
        out_specs=pl.BlockSpec((tb, 3 * l_pad), lambda i: (i, 0)),
        compiler_params=pltpu.CompilerParams(
            dimension_semantics=("parallel",),       # shard batch across TCs (v7x)
            vmem_limit_bytes=_vmem_limit_bytes(tb, d_pad, h1_pad, h2_pad, l_pad),
        ),
        cost_estimate=pl.CostEstimate(
            flops=flops,
            transcendentals=b_pad * l_pad,
            bytes_accessed=bytes_accessed),
    )(x_flat, packed["w1"], packed["b1"], packed["w2"], packed["b2"],
      packed["wh"], packed["bh"], eps_p)

    z_mean = out[:b, :latent_dim].astype(jnp.float32)
    log_var = out[:b, l_pad:l_pad + latent_dim].astype(jnp.float32)
    z = out[:b, 2 * l_pad:2 * l_pad + latent_dim].astype(jnp.float32)
    return z_mean, log_var, z


# --------------------------------------------------------------------------
if __name__ == "__main__":
    # Small EEG-like input: batch=2, 4 channels x 16 time samples -> input_dim=64
    batch = 2
    chans, time_pts = 4, 16
    input_dim = chans * time_pts
    hidden_dims = [32, 32]
    latent_dim = 8

    key = jax.random.PRNGKey(0)
    k_params, k_x, k_eps = jax.random.split(key, 3)

    params = init_params(k_params, input_dim, hidden_dims, latent_dim)
    packed = pack_params(params)
    x = jax.random.normal(k_x, (batch, chans, time_pts), dtype=jnp.float32)

    # Sample epsilon directly at the padded kernel shape (no wrapper pad pass).
    b_pad, l_pad = padded_latent_shape(packed, batch)
    eps_p = jax.random.normal(k_eps, (b_pad, l_pad), dtype=jnp.float32)

    z_mean, log_var, z = encoder_forward(x, packed, eps_p, latent_dim=latent_dim)
    jax.block_until_ready((z_mean, log_var, z))

    # Reference in plain f32 JAX (same math path as the PyTorch module).
    # Kernel uses bf16 inputs / f32 accumulation / bf16 writeback, so
    # tolerance is bf16-level.
    epsilon = eps_p[:batch, :latent_dim]
    xf = x.reshape(batch, -1).astype(jnp.float32)
    h1 = jnp.maximum(xf @ params["w1"] + params["b1"], 0.0)
    h2 = jnp.maximum(h1 @ params["w2"] + params["b2"], 0.0)
    zm_ref = h2 @ params["wm"] + params["bm"]
    lv_ref = h2 @ params["wv"] + params["bv"]
    z_ref = zm_ref + jnp.exp(0.5 * lv_ref) * epsilon

    assert z_mean.shape == (batch, latent_dim)
    assert log_var.shape == (batch, latent_dim)
    assert z.shape == (batch, latent_dim)
    assert jnp.allclose(z_mean, zm_ref, atol=5e-2, rtol=5e-2)
    assert jnp.allclose(log_var, lv_ref, atol=5e-2, rtol=5e-2)
    assert jnp.allclose(z, z_ref, atol=5e-2, rtol=5e-2)

    print("KERNEL_OK")
</pallas_src>

<mosaic_0001>
module attributes {stable_mosaic.version = 11 : i64} {
  func.func @encoder_kernel(%arg0: i32, %arg1: memref<16x128xbf16, #tpu.memory_space<vmem>>, %arg2: memref<128x128xbf16, #tpu.memory_space<vmem>>, %arg3: memref<1x128xf32, #tpu.memory_space<vmem>>, %arg4: memref<128x128xbf16, #tpu.memory_space<vmem>>, %arg5: memref<1x128xf32, #tpu.memory_space<vmem>>, %arg6: memref<128x256xbf16, #tpu.memory_space<vmem>>, %arg7: memref<1x256xf32, #tpu.memory_space<vmem>>, %arg8: memref<16x128xf32, #tpu.memory_space<vmem>>, %arg9: memref<16x384xbf16, #tpu.memory_space<vmem>>) attributes {dimension_semantics = [#tpu.dimension_semantics<parallel>], iteration_bounds = array<i64: 1>, scalar_prefetch = 0 : i64, scratch_operands = 0 : i64, tpu.core_type = #tpu.core_type<tc>, window_params = [{transform_indices = @transform_0, window_bounds = array<i64: 16, 128>}, {pipeline_mode = #tpu.pipeline_mode<synchronous>, transform_indices = @transform_1, window_bounds = array<i64: 128, 128>}, {pipeline_mode = #tpu.pipeline_mode<synchronous>, transform_indices = @transform_2, window_bounds = array<i64: 1, 128>}, {pipeline_mode = #tpu.pipeline_mode<synchronous>, transform_indices = @transform_3, window_bounds = array<i64: 128, 128>}, {pipeline_mode = #tpu.pipeline_mode<synchronous>, transform_indices = @transform_4, window_bounds = array<i64: 1, 128>}, {pipeline_mode = #tpu.pipeline_mode<synchronous>, transform_indices = @transform_5, window_bounds = array<i64: 128, 256>}, {pipeline_mode = #tpu.pipeline_mode<synchronous>, transform_indices = @transform_6, window_bounds = array<i64: 1, 256>}, {transform_indices = @transform_7, window_bounds = array<i64: 16, 128>}, {transform_indices = @transform_8, window_bounds = array<i64: 16, 384>}]} {
    %c0 = arith.constant 0 : index
    %c0_0 = arith.constant 0 : index
    %0 = vector.load %arg1[%c0, %c0_0] : memref<16x128xbf16, #tpu.memory_space<vmem>>, vector<16x128xbf16>
    %c0_1 = arith.constant 0 : index
    %c0_2 = arith.constant 0 : index
    %1 = vector.load %arg2[%c0_1, %c0_2] : memref<128x128xbf16, #tpu.memory_space<vmem>>, vector<128x128xbf16>
    %cst = arith.constant dense<0.000000e+00> : vector<16x128xf32>
    %2 = tpu.matmul %0, %1, %cst {dimension_numbers = #tpu.dot_dimension_numbers<[1], [0], [0], [1], [0, 0, 1, 1], [], []>} : vector<16x128xbf16>, vector<128x128xbf16>, vector<16x128xf32> -> vector<16x128xf32>
    %c0_3 = arith.constant 0 : index
    %c0_4 = arith.constant 0 : index
    %3 = vector.load %arg3[%c0_3, %c0_4] : memref<1x128xf32, #tpu.memory_space<vmem>>, vector<1x128xf32>
    %4 = vector.broadcast %3 : vector<1x128xf32> to vector<16x128xf32>
    %5 = arith.addf %2, %4 : vector<16x128xf32>
    %cst_5 = arith.constant 0.000000e+00 : f32
    %6 = vector.broadcast %cst_5 : f32 to vector<16x128xf32>
    %7 = arith.maximumf %5, %6 : vector<16x128xf32>
    %8 = arith.truncf %7 : vector<16x128xf32> to vector<16x128xbf16>
    %c0_6 = arith.constant 0 : index
    %c0_7 = arith.constant 0 : index
    %9 = vector.load %arg4[%c0_6, %c0_7] : memref<128x128xbf16, #tpu.memory_space<vmem>>, vector<128x128xbf16>
    %cst_8 = arith.constant dense<0.000000e+00> : vector<16x128xf32>
    %10 = tpu.matmul %8, %9, %cst_8 {dimension_numbers = #tpu.dot_dimension_numbers<[1], [0], [0], [1], [0, 0, 1, 1], [], []>} : vector<16x128xbf16>, vector<128x128xbf16>, vector<16x128xf32> -> vector<16x128xf32>
    %c0_9 = arith.constant 0 : index
    %c0_10 = arith.constant 0 : index
    %11 = vector.load %arg5[%c0_9, %c0_10] : memref<1x128xf32, #tpu.memory_space<vmem>>, vector<1x128xf32>
    %12 = vector.broadcast %11 : vector<1x128xf32> to vector<16x128xf32>
    %13 = arith.addf %10, %12 : vector<16x128xf32>
    %cst_11 = arith.constant 0.000000e+00 : f32
    %14 = vector.broadcast %cst_11 : f32 to vector<16x128xf32>
    %15 = arith.maximumf %13, %14 : vector<16x128xf32>
    %16 = arith.truncf %15 : vector<16x128xf32> to vector<16x128xbf16>
    %c0_12 = arith.constant 0 : index
    %c0_13 = arith.constant 0 : index
    %17 = vector.load %arg6[%c0_12, %c0_13] : memref<128x256xbf16, #tpu.memory_space<vmem>>, vector<128x256xbf16>
    %cst_14 = arith.constant dense<0.000000e+00> : vector<16x256xf32>
    %18 = tpu.matmul %16, %17, %cst_14 {dimension_numbers = #tpu.dot_dimension_numbers<[1], [0], [0], [1], [0, 0, 1, 1], [], []>} : vector<16x128xbf16>, vector<128x256xbf16>, vector<16x256xf32> -> vector<16x256xf32>
    %c0_15 = arith.constant 0 : index
    %c0_16 = arith.constant 0 : index
    %19 = vector.load %arg7[%c0_15, %c0_16] : memref<1x256xf32, #tpu.memory_space<vmem>>, vector<1x256xf32>
    %20 = vector.broadcast %19 : vector<1x256xf32> to vector<16x256xf32>
    %21 = arith.addf %18, %20 : vector<16x256xf32>
    %22 = vector.extract_strided_slice %21 {offsets = [0, 0], sizes = [16, 128], strides = [1, 1]} : vector<16x256xf32> to vector<16x128xf32>
    %23 = vector.extract_strided_slice %21 {offsets = [0, 128], sizes = [16, 128], strides = [1, 1]} : vector<16x256xf32> to vector<16x128xf32>
    %cst_17 = arith.constant 5.000000e-01 : f32
    %24 = vector.broadcast %cst_17 : f32 to vector<16x128xf32>
    %25 = arith.mulf %24, %23 : vector<16x128xf32>
    %26 = math.exp %25 : vector<16x128xf32>
    %c0_18 = arith.constant 0 : index
    %c0_19 = arith.constant 0 : index
    %27 = vector.load %arg8[%c0_18, %c0_19] : memref<16x128xf32, #tpu.memory_space<vmem>>, vector<16x128xf32>
    %28 = arith.mulf %26, %27 : vector<16x128xf32>
    %29 = arith.addf %22, %28 : vector<16x128xf32>
    %30 = arith.truncf %21 : vector<16x256xf32> to vector<16x256xbf16>
    %c0_20 = arith.constant 0 : index
    %c0_21 = arith.constant 0 : index
    %31 = vector.load %arg9[%c0_20, %c0_21] : memref<16x384xbf16, #tpu.memory_space<vmem>>, vector<16x256xbf16>
    tpu.vector_store %arg9[%c0_20, %c0_21], %30 {strides = array<i32>} : memref<16x384xbf16, #tpu.memory_space<vmem>>, vector<16x256xbf16>,
    %32 = arith.truncf %29 : vector<16x128xf32> to vector<16x128xbf16>
    %c0_22 = arith.constant 0 : index
    %c256 = arith.constant 256 : index
    %33 = vector.load %arg9[%c0_22, %c256] : memref<16x384xbf16, #tpu.memory_space<vmem>>, vector<16x128xbf16>
    tpu.vector_store %arg9[%c0_22, %c256], %32 {strides = array<i32>} : memref<16x384xbf16, #tpu.memory_space<vmem>>, vector<16x128xbf16>,
    return
  }
  func.func @transform_0(%arg0: i32) -> (i32, i32) {
    %c0_i32 = arith.constant 0 : i32
    %c0_i32_0 = arith.constant 0 : i32
    return %arg0, %c0_i32 : i32, i32
  }
  func.func @transform_1(%arg0: i32) -> (i32, i32) {
    %c0_i32 = arith.constant 0 : i32
    %c0_i32_0 = arith.constant 0 : i32
    %c0_i32_1 = arith.constant 0 : i32
    return %c0_i32, %c0_i32_0 : i32, i32
  }
  func.func @transform_2(%arg0: i32) -> (i32, i32) {
    %c0_i32 = arith.constant 0 : i32
    %c0_i32_0 = arith.constant 0 : i32
    %c0_i32_1 = arith.constant 0 : i32
    return %c0_i32, %c0_i32_0 : i32, i32
  }
  func.func @transform_3(%arg0: i32) -> (i32, i32) {
    %c0_i32 = arith.constant 0 : i32
    %c0_i32_0 = arith.constant 0 : i32
    %c0_i32_1 = arith.constant 0 : i32
    return %c0_i32, %c0_i32_0 : i32, i32
  }
  func.func @transform_4(%arg0: i32) -> (i32, i32) {
    %c0_i32 = arith.constant 0 : i32
    %c0_i32_0 = arith.constant 0 : i32
    %c0_i32_1 = arith.constant 0 : i32
    return %c0_i32, %c0_i32_0 : i32, i32
  }
  func.func @transform_5(%arg0: i32) -> (i32, i32) {
    %c0_i32 = arith.constant 0 : i32
    %c0_i32_0 = arith.constant 0 : i32
    %c0_i32_1 = arith.constant 0 : i32
    return %c0_i32, %c0_i32_0 : i32, i32
  }
  func.func @transform_6(%arg0: i32) -> (i32, i32) {
    %c0_i32 = arith.constant 0 : i32
    %c0_i32_0 = arith.constant 0 : i32
    %c0_i32_1 = arith.constant 0 : i32
    return %c0_i32, %c0_i32_0 : i32, i32
  }
  func.func @transform_7(%arg0: i32) -> (i32, i32) {
    %c0_i32 = arith.constant 0 : i32
    %c0_i32_0 = arith.constant 0 : i32
    return %arg0, %c0_i32 : i32, i32
  }
  func.func @transform_8(%arg0: i32) -> (i32, i32) {
    %c0_i32 = arith.constant 0 : i32
    %c0_i32_0 = arith.constant 0 : i32
    return %arg0, %c0_i32 : i32, i32
  }
}

</mosaic_0001>

<bundles_post_ra>
// kernel: encoder_forward.1
= control target key start
LH: loop header
LB: loop body
LE: loop exit
PB: predicated region body
PF: predicated region fallthrough
CT: control target
= control target key end

     0   :  { %13 = vsyncpa [#allocation3], 0  ;;  %s856_s0 = inlined_call_operand.vmem [shape: bf16[16,128], index: 0, kind: input, shape index: {}]   ;;  %s857_s1 = inlined_call_operand.hbm [shape: bf16[128,128], index: 1, kind: input, shape index: {}]   ;;  %s858_s2 = inlined_call_operand.vmem [shape: f32[1,128], index: 2, kind: input, shape index: {}]   ;;  %s859_s3 = inlined_call_operand.hbm [shape: bf16[128,128], index: 3, kind: input, shape index: {}]   ;;  %s860_s4 = inlined_call_operand.vmem [shape: f32[1,128], index: 4, kind: input, shape index: {}]   ;;  %s861_s5 = inlined_call_operand.hbm [shape: bf16[128,256], index: 5, kind: input, shape index: {}]   ;;  %s862_s6 = inlined_call_operand.vmem [shape: f32[1,256], index: 6, kind: input, shape index: {}]   ;;  %s863_s7 = inlined_call_operand.vmem [shape: f32[16,128], index: 7, kind: input, shape index: {}]   ;;  %s864_s8 = inlined_call_operand.vmem [shape: bf16[16,384], index: 8, kind: output, shape index: {}]  }
   0x1   :  { %14 = vsyncpa [#allocation5], 0  ;;  %s728_s27 = smov [#allocation4]   ;;  %s729_s29 = smov [#allocation2]  }
   0x2   :  { %s36_s28 = sshll.u32 %s728_s27, 4  ;;  %s22_s30 = sshll.u32 %s729_s29, 4  ;;  %s37_s28 = int_to_ptr.vmem [resolvable:$true] %s36_s28  ;;  %s783_s30 = int_to_ptr.vmem [resolvable:$true] %s22_s30 }
   0x3   :  { %s658_s11 = scalar_lea.hbm %s859_s3, 1024 }
   0x4   :  { %p659_p0 = scmp.ne.s32.totalorder %s859_s3, %s658_s11  ;;  %p662_p1 = scmp.lt.u32.totalorder %s658_s11, %s859_s3 }
   0x6   :  { %p664_p2 = pnand %p662_p1, %p659_p0 }
   0x8   :  { %667 = shalt.err (!%p664_p2)
}
   0x9   :  { %s668_s16 = scalar_lea.vmem %s37_s28, 1024  ;;  %p673_p4 = scmp.lt.s32.totalorder %s37_s28, %s37_s28 }
   0xa   :  { %p669_p3 = scmp.ne.s32.totalorder %s37_s28, %s668_s16  ;;  %p674_p5 = scmp.lt.s32.totalorder %s668_s16, %s668_s16 }
   0xc   :  { %p675_p6 = por %p674_p5, %p673_p4 }
   0xe   :  { %p676_p7 = pnand %p675_p6, %p669_p3 }
  0x10   :  { %679 = shalt.err (!%p676_p7)
}
  0x11   :  { %s730_s17 = smov 64   ;;  %s731_s18 = smov 4  }
  0x12   :  { %42 = dma.hbm_to_vmem [thread:$0]  %s859_s3, 1024, %s37_s28, [#allocation5], %s730_s17, %s730_s17, %s731_s18  }
  0x13   :  { %s680_s23 = scalar_lea.hbm %s857_s1, 1024 }
  0x14   :  { %p681_p8 = scmp.ne.s32.totalorder %s857_s1, %s680_s23  ;;  %p684_p9 = scmp.lt.u32.totalorder %s680_s23, %s857_s1 }
  0x16   :  { %p686_p10 = pnand %p684_p9, %p681_p8 }
  0x18   :  { %689 = shalt.err (!%p686_p10)
}
  0x19   :  { %s690_s29 = scalar_lea.vmem %s783_s30, 1024  ;;  %p695_p12 = scmp.lt.s32.totalorder %s783_s30, %s783_s30 }
  0x1a   :  { %p691_p11 = scmp.ne.s32.totalorder %s783_s30, %s690_s29  ;;  %p696_p13 = scmp.lt.s32.totalorder %s690_s29, %s690_s29 }
  0x1c   :  { %p697_p0 = por %p696_p13, %p695_p12 }
  0x1e   :  { %p698_p1 = pnand %p697_p0, %p691_p11 }
  0x20   :  { %701 = shalt.err (!%p698_p1)
}
  0x21   :  { %28 = dma.hbm_to_vmem [thread:$0]  %s857_s1, 1024, %s783_s30, [#allocation3], %s730_s17, %s730_s17, %s731_s18  }
  0x22   :  { %s732_s9 = smov [#allocation6]   ;;  %s702_s13 = scalar_lea.hbm %s861_s5, 2048 }
  0x23   :  { %s50_s10 = sshll.u32 %s732_s9, 4  ;;  %p703_p2 = scmp.ne.s32.totalorder %s861_s5, %s702_s13  ;;  %s51_s10 = int_to_ptr.vmem [resolvable:$true] %s50_s10 }
  0x24   :  { %p706_p3 = scmp.lt.u32.totalorder %s702_s13, %s861_s5 }
  0x26   :  { %p708_p4 = pnand %p706_p3, %p703_p2 }
  0x28   :  { %711 = shalt.err (!%p708_p4)
}
  0x29   :  { %s712_s20 = scalar_lea.vmem %s51_s10, 2048  ;;  %p717_p6 = scmp.lt.s32.totalorder %s51_s10, %s51_s10 }
  0x2a   :  { %p713_p5 = scmp.ne.s32.totalorder %s51_s10, %s712_s20  ;;  %p718_p7 = scmp.lt.s32.totalorder %s712_s20, %s712_s20 }
  0x2c   :  { %p719_p8 = por %p718_p7, %p717_p6 }
  0x2e   :  { %p720_p9 = pnand %p719_p8, %p713_p5 }
  0x30   :  { %723 = shalt.err (!%p720_p9)
}
  0x31   :  { %s733_s1 = smov 128   ;;  %s734_s30 = smov 8  }
  0x32   :  { %56 = dma.hbm_to_vmem [thread:$0]  %s861_s5, 2048, %s51_s10, [#allocation5], %s733_s1, %s733_s1, %s734_s30  }
  0x33   :  { %724 = dma.done.wait [#allocation3], 1024  }
  0x34   :  { %725 = vsyncadd [#allocation3], 4294966272 }
  0x35   :  { %726 = dma.done.wait [#allocation5], 3072  }
  0x36   :  { %727 = vsyncadd [#allocation5], 4294964224  ;;  %v735_v0 = vmov 0.0   ;;  %vm736_vm0 = vmmov 0   ;;  %v613_v1 = vld [vmem:[#allocation2] sm:$0xff]   ;;  %v614_v2 = vld [vmem:[#allocation2 + $0x8] sm:$0xff]   ;;  %v327_v55 = vlaneseq }
  0x37   :  { %563 = vmatprep.subr.bf16.mxu0 %v735_v0  ;;  %579 = vmatprep.mubr.msk.bf16.mxu0 %vm736_vm0, %v735_v0  ;;  %v615_v3 = vld [vmem:[#allocation2 + $0x10] sm:$0xff]   ;;  %v622_v4 = vld [vmem:[#allocation4] sm:$0xff]   ;;  %v616_v5 = vld [vmem:[#allocation2 + $0x18] sm:$0xff]   ;;  %v737_v44 = vmov 0  }
  0x38   :  { %583 = vmatprep.subr.bf16.mxu1 %v735_v0  ;;  %599 = vmatprep.mubr.msk.bf16.mxu1 %vm736_vm0, %v735_v0  ;;  %v623_v6 = vld [vmem:[#allocation4 + $0x8] sm:$0xff]   ;;  %v617_v7 = vld [vmem:[#allocation2 + $0x20] sm:$0xff]   ;;  %v624_v8 = vld [vmem:[#allocation4 + $0x10] sm:$0xff]   ;;  %v328_v56 = vshrl.u32 %v327_v55, 7 }
  0x39   :  { %564 = vmatpush3.bf16.msra.mxu0 %v613_v1  ;;  %584 = vmatpush3.bf16.msra.mxu1 %v622_v4  ;;  %v618_v9 = vld [vmem:[#allocation2 + $0x28] sm:$0xff]   ;;  %v625_v10 = vld [vmem:[#allocation4 + $0x18] sm:$0xff]   ;;  %v619_v11 = vld [vmem:[#allocation2 + $0x30] sm:$0xff]  }
  0x3a   :  { %565 = vmatprep.subr.bf16.mxu0 %v735_v0  ;;  %585 = vmatprep.subr.bf16.mxu1 %v735_v0  ;;  %v626_v12 = vld [vmem:[#allocation4 + $0x20] sm:$0xff]   ;;  %v620_v13 = vld [vmem:[#allocation2 + $0x38] sm:$0xff]   ;;  %v627_v14 = vld [vmem:[#allocation4 + $0x28] sm:$0xff]   ;;  %v329_v57 = vsub.s32 0, %v328_v56  ;;  %v333_v59 = vsub.s32 1, %v328_v56 }
  0x3b   :  { %v621_v15 = vld [vmem:[%s856_s0] sm:$0xff]   ;;  %v628_v16 = vld [vmem:[#allocation4 + $0x30] sm:$0xff]   ;;  %v629_v17 = vld [vmem:[#allocation4 + $0x38] sm:$0xff]  }
  0x3c   :  { %v630_v18 = vld [vmem:[#allocation6] ss:$8 sps:$4 sm:$0xff]   ;;  %v632_v19 = vld [vmem:[#allocation6 + $0x4] ss:$8 sps:$4 sm:$0xff]   ;;  %v635_v20 = vld [vmem:[#allocation6 + $0x14] ss:$8 sps:$4 sm:$0xff]  }
  0x3d   :  { %566 = vmatpush3.bf16.msra.mxu0 %v614_v2  ;;  %586 = vmatpush3.bf16.msra.mxu1 %v623_v6  ;;  %v633_v21 = vld [vmem:[#allocation6 + $0x10] ss:$8 sps:$4 sm:$0xff]   ;;  %v638_v22 = vld [vmem:[#allocation6 + $0x24] ss:$8 sps:$4 sm:$0xff]   ;;  %v636_v23 = vld [vmem:[#allocation6 + $0x20] ss:$8 sps:$4 sm:$0xff]  }
  0x3e   :  { %567 = vmatprep.subr.bf16.mxu0 %v735_v0  ;;  %587 = vmatprep.subr.bf16.mxu1 %v735_v0  ;;  %v641_v24 = vld [vmem:[#allocation6 + $0x34] ss:$8 sps:$4 sm:$0xff]   ;;  %v639_v25 = vld [vmem:[#allocation6 + $0x30] ss:$8 sps:$4 sm:$0xff]   ;;  %v644_v26 = vld [vmem:[#allocation6 + $0x44] ss:$8 sps:$4 sm:$0xff]  }
  0x3f   :  { %v642_v27 = vld [vmem:[#allocation6 + $0x40] ss:$8 sps:$4 sm:$0xff]   ;;  %v647_v28 = vld [vmem:[#allocation6 + $0x54] ss:$8 sps:$4 sm:$0xff]   ;;  %v645_v29 = vld [vmem:[#allocation6 + $0x50] ss:$8 sps:$4 sm:$0xff]  }
  0x40   :  { %v502_v30 = vld [vmem:[%s858_s2] ss:$0 sm:$0xff]  ;;  %v650_v40 = vld [vmem:[#allocation6 + $0x64] ss:$8 sps:$4 sm:$0xff]   ;;  %v653_v42 = vld [vmem:[#allocation6 + $0x74] ss:$8 sps:$4 sm:$0xff]  }
  0x41   :  { %568 = vmatpush3.bf16.msra.mxu0 %v615_v3  ;;  %588 = vmatpush3.bf16.msra.mxu1 %v624_v8  ;;  %v648_v41 = vld [vmem:[#allocation6 + $0x60] ss:$8 sps:$4 sm:$0xff]   ;;  %v651_v43 = vld [vmem:[#allocation6 + $0x70] ss:$8 sps:$4 sm:$0xff]  }
  0x42   :  { %569 = vmatprep.subr.bf16.mxu0 %v735_v0  ;;  %589 = vmatprep.subr.bf16.mxu1 %v735_v0  ;;  %v512_v45 = vld [vmem:[%s860_s4] ss:$0 sm:$0xff] }
  0x43   :  { %v325_v58 = vld [vmem:[%s862_s6] sm:$0x3] }
  0x44   :  { %v330_v60 = vrot.slane %v325_v58, %v329_v57  ;;  %v334_v61 = vrot.slane %v325_v58, %v333_v59 }
  0x45   :  { %570 = vmatpush3.bf16.msra.mxu0 %v616_v5  ;;  %590 = vmatpush3.bf16.msra.mxu1 %v625_v10 }
  0x46   :  { %571 = vmatprep.subr.bf16.mxu0 %v735_v0  ;;  %591 = vmatprep.subr.bf16.mxu1 %v735_v0 }
  0x49   :  { %572 = vmatpush3.bf16.msra.mxu0 %v617_v7  ;;  %592 = vmatpush3.bf16.msra.mxu1 %v626_v12  ;;  %v466_v12 = vld [vmem:[%s863_s7] sm:$0xff] }
  0x4a   :  { %573 = vmatprep.subr.bf16.mxu0 %v735_v0  ;;  %593 = vmatprep.subr.bf16.mxu1 %v735_v0 }
  0x4d   :  { %574 = vmatpush3.bf16.msra.mxu0 %v618_v9  ;;  %594 = vmatpush3.bf16.msra.mxu1 %v627_v14  ;;  %v467_v14 = vld [vmem:[%s863_s7 + $0x8] sm:$0xff] }
  0x4e   :  { %575 = vmatprep.subr.bf16.mxu0 %v735_v0  ;;  %595 = vmatprep.subr.bf16.mxu1 %v735_v0 }
  0x51   :  { %576 = vmatpush3.bf16.msra.mxu0 %v619_v11  ;;  %596 = vmatpush3.bf16.msra.mxu1 %v628_v16 }
  0x52   :  { %577 = vmatprep.subr.bf16.mxu0 %v735_v0  ;;  %597 = vmatprep.subr.bf16.mxu1 %v735_v0 }
  0x55   :  { %578 = vmatpush3.bf16.msra.mxu0 %v620_v13  ;;  %598 = vmatpush3.bf16.msra.mxu1 %v629_v17 }
  0x56   :  { %417 = vmatprep.subr.bf16.mxu0 %v632_v19 }
  0x58   :  { %580 = vmatmul.mubr.bf16.vlgmr.msra.gmra.mrb[0].mxu0 %v621_v15 }
  0x59   :  { %418 = vmatpush1.bf16.msra.mxu0 %v630_v18  ;;  %449 = vmatprep.mubr.bf16.mxu0 %v737_v44 }
  0x5a   :  { %419 = vmatprep.subr.bf16.mxu0 %v635_v20 }
  0x5d   :  { %420 = vmatpush1.bf16.msra.mxu0 %v633_v21 }
  0x5e   :  { %421 = vmatprep.subr.bf16.mxu0 %v638_v22 }
  0x61   :  { %422 = vmatpush1.bf16.msra.mxu0 %v636_v23 }
  0x62   :  { %423 = vmatprep.subr.bf16.mxu0 %v641_v24 }
  0x65   :  { %424 = vmatpush1.bf16.msra.mxu0 %v639_v25 }
  0x66   :  { %425 = vmatprep.subr.bf16.mxu0 %v644_v26 }
  0x69   :  { %426 = vmatpush1.bf16.msra.mxu0 %v642_v27 }
  0x6a   :  { %427 = vmatprep.subr.bf16.mxu0 %v647_v28 }
  0x6d   :  { %428 = vmatpush1.bf16.msra.mxu0 %v645_v29 }
  0x6e   :  { %429 = vmatprep.subr.bf16.mxu0 %v650_v40 }
  0x71   :  { %430 = vmatpush1.bf16.msra.mxu0 %v648_v41 }
  0x72   :  { %431 = vmatprep.subr.bf16.mxu0 %v653_v42 }
  0x75   :  { %432 = vmatpush1.bf16.msra.mxu0 %v651_v43 }
 0x12b   :  { %v184_v31 = vpop.f32.mrb[0].mxu0 }
 0x12c   :  { %v185_v32 = vadd.f32 %v502_v30, %v184_v31  ;;  %v581_v33 = vpop.f32.mrb[1].mxu0 }
 0x12d   :  { %v187_v34 = vpop.f32.mrb[2].mxu0 }
 0x12e   :  { %v188_v35 = vadd.f32 %v502_v30, %v187_v34  ;;  %v582_v36 = vpop.f32.mrb[3].mxu0  ;;  %v191_v37 = vmax.f32 %v185_v32, 0.0 }
 0x130   :  { %v192_v38 = vmax.f32 %v188_v35, 0.0 }
 0x132   :  { %v193_v39 = vpack.c.bf16 %v192_v38, %v191_v37 }
 0x134   :  { %600 = vmatmul.mubr.bf16.vlgmr.msra.gmra.mrb[0].mxu1 %v193_v39 }
 0x207   :  { %v299_v46 = vpop.f32.mrb[0].mxu1 }
 0x208   :  { %v300_v47 = vadd.f32 %v512_v45, %v299_v46  ;;  %v601_v48 = vpop.f32.mrb[1].mxu1 }
 0x209   :  { %v302_v49 = vpop.f32.mrb[2].mxu1 }
 0x20a   :  { %v303_v50 = vadd.f32 %v512_v45, %v302_v49  ;;  %v602_v51 = vpop.f32.mrb[3].mxu1  ;;  %v306_v52 = vmax.f32 %v300_v47, 0.0 }
 0x20c   :  { %v307_v53 = vmax.f32 %v303_v50, 0.0 }
 0x20e   :  { %v308_v54 = vpack.c.bf16 %v307_v53, %v306_v52 }
 0x210   :  { %450 = vmatmul.mubr.bf16.vlgmr.msra.gmra.mrb[4].mxu0 %v308_v54 }
 0x2e3   :  { %v451_v62 = vpop.f32.mrb[4].mxu0 }
 0x2e4   :  { %v452_v63 = vadd.f32 %v451_v62, %v330_v60  ;;  %v453_v0 = vpop.f32.mrb[5].mxu0 }
 0x2e5   :  { %v454_v1 = vadd.f32 %v453_v0, %v334_v61  ;;  %v455_v2 = vpop.f32.mrb[6].mxu0 }
 0x2e6   :  { %v456_v3 = vadd.f32 %v455_v2, %v330_v60  ;;  %v457_v4 = vpop.f32.mrb[7].mxu0 }
 0x2e7   :  { %v460_v5 = vmul.f32 0.5, %v454_v1  ;;  %v541_v6 = vpack.c.bf16 %v454_v1, %v452_v63  ;;  %v458_v7 = vadd.f32 %v457_v4, %v334_v61 }
 0x2e9   :  { %v462_v8 = vmul.f32 1.442695, %v460_v5  ;;  %484 = vst [vmem:[%s864_s8] sm:$0xff] %v541_v6  ;;  %v461_v9 = vmul.f32 0.5, %v458_v7  ;;  %v542_v10 = vpack.c.bf16 %v458_v7, %v456_v3 }
 0x2eb   :  { %654 = vpow2.f32 %v462_v8  ;;  %v464_v11 = vmul.f32 1.442695, %v461_v9  ;;  %485 = vst [vmem:[%s864_s8 + $0xc] sm:$0xff] %v542_v10 }
 0x2ed   :  { %656 = vpow2.f32 %v464_v11 }
 0x2f5   :  { %v655_v13 = vpop.eup %654 }
 0x2f6   :  { %v468_v15 = vmul.f32 %v655_v13, %v466_v12 }
 0x2f7   :  { %v657_v16 = vpop.eup %656 }
 0x2f8   :  { %v470_v17 = vadd.f32 %v468_v15, %v452_v63  ;;  %v469_v18 = vmul.f32 %v657_v16, %v467_v14 }
 0x2fa   :  { %v543_v19 = vpack.c.bf16 %v470_v17, %v470_v17  ;;  %v471_v20 = vadd.f32 %v469_v18, %v456_v3 }
 0x2fc   :  { %494 = vst [vmem:[%s864_s8 + $0x8] sm:$0xf] %v543_v19  ;;  %v544_v21 = vpack.c.bf16 %v471_v20, %v471_v20 }
 0x2fe   :  { %495 = vst [vmem:[%s864_s8 + $0x14] sm:$0xf] %v544_v21 }
 0x2ff   :  { %500 = vsyncpa [#allocation3], 1 }
 0x300   :  { %501 = vsyncpa [#allocation5], 1 }

</bundles_post_ra>
